<compile_context>
chip_gen: v7x
topology: tpu7x:2x2x1
jax: 0.10.0
libtpu: 0.0.40
codegen_flags: <defaults>
</compile_context>

<pallas_src>
import functools

import jax
import jax.numpy as jnp
from jax.experimental import pallas as pl
from jax.experimental.pallas import tpu as pltpu


@functools.lru_cache(maxsize=1)
def _vmem_capacity_bytes():
    try:
        return int(pltpu.get_tpu_info().vmem_capacity_bytes)
    except Exception:
        return 64 * 1024 * 1024  # conservative fallback (v7x per-TC size)


# ---------------------------------------------------------------------------
# Kernel 1: masked NLL partials. Each grid block emits a (1,1,2) tile:
#   [:, :, 0] = sum(-logp[row, target[row]] * mask[row])  over its rows
#   [:, :, 1] = count(mask[row] > 0)                       over its rows
# Rows beyond n_rows (edge block) are masked out in-kernel via mask zeroing;
# the gathered value for such rows is discarded by a select (never multiplied),
# so garbage / -inf in padded rows cannot produce NaN.
# ---------------------------------------------------------------------------
def _masked_nll_kernel(logp_ref, tgt_ref, mask_ref, out_ref, *, n_rows):
    i = pl.program_id(0)

    logp = logp_ref[...]                                # (TR, V) native dtype
    tgt = tgt_ref[...]                                  # (TR, 1) int32
    mask = mask_ref[...]                                # (TR, 1) f32

    tr, v = logp.shape
    row_ids = jax.lax.broadcasted_iota(jnp.int32, (tr, 1), 0) + i * tr
    mask_g = jnp.where(row_ids < n_rows, mask, 0.0)     # zero out-of-range rows

    # Gather logp[row, tgt[row]] via lane select + lane reduce; exact in any
    # float dtype because at most one element per row is non-zero.
    vocab_ids = jax.lax.broadcasted_iota(jnp.int32, (tr, v), 1)
    sel = vocab_ids == tgt
    gathered = jnp.sum(jnp.where(sel, logp, 0.0),
                       axis=1, keepdims=True).astype(jnp.float32)   # (TR, 1)
    # Select (not multiply) so -inf / garbage rows with zero mask stay out.
    safe_g = jnp.where(mask_g != 0.0, gathered, 0.0)

    loss_part = -jnp.sum(safe_g * mask_g)
    cnt_part = jnp.sum((mask_g > 0.0).astype(jnp.float32))
    col = jax.lax.broadcasted_iota(jnp.int32, (1, 1, 2), 2)
    out_ref[...] = jnp.where(col == 0, loss_part, cnt_part)


def masked_nll_sums(logp, target, mask):
    """Returns (sum(-logp[b,t,target[b,t]] * mask[b,t]), count(mask[b,t] > 0))."""
    B, T, V = logp.shape
    n = B * T

    logp2 = logp.reshape(n, V)                          # keep original dtype
    tgt2 = target[:, :T].reshape(n, 1).astype(jnp.int32)
    mask2 = mask[:, :T].reshape(n, 1).astype(jnp.float32)

    itemsize = jnp.dtype(logp.dtype).itemsize
    vmem_cap = _vmem_capacity_bytes()
    nll_budget = vmem_cap // 3                          # logp dbl-buf + intermediates
    vmem_limit = (vmem_cap * 3) // 4

    # Per-row VMEM: double-buffered logp tile + ~3 f32-wide (TR,V) intermediates
    # (vocab iota, compare, selected values) produced by the gather.
    bytes_per_row = V * (2 * itemsize + 3 * 4)
    max_rows = max(8, (nll_budget // bytes_per_row) // 8 * 8)

    # Largest tile that fits the budget, but keep >= MIN_BLOCKS grid steps when
    # possible so both v7x TensorCores get work and DMA/compute can pipeline.
    MIN_BLOCKS = 4
    tr_split = ((-(-n // MIN_BLOCKS) + 7) // 8) * 8
    tr = min(max_rows, max(8, tr_split))
    nb = -(-n // tr)                                    # edge rows masked in-kernel

    kernel = functools.partial(_masked_nll_kernel, n_rows=n)
    parts = pl.pallas_call(
        kernel,
        out_shape=jax.ShapeDtypeStruct((nb, 1, 2), jnp.float32),
        grid=(nb,),
        in_specs=[
            pl.BlockSpec((tr, V), lambda i: (i, 0)),
            pl.BlockSpec((tr, 1), lambda i: (i, 0)),
            pl.BlockSpec((tr, 1), lambda i: (i, 0)),
        ],
        out_specs=pl.BlockSpec((1, 1, 2), lambda i: (i, 0, 0)),
        compiler_params=pltpu.CompilerParams(
            dimension_semantics=("parallel",),
            vmem_limit_bytes=vmem_limit),
    )(logp2, tgt2, mask2)

    return jnp.sum(parts[..., 0]), jnp.sum(parts[..., 1])


# ---------------------------------------------------------------------------
# Kernel 2: binary cross-entropy partial sums (mean taken in the wrapper).
# Matches torch.nn.BCELoss (log clamped at -100, mean reduction). Row-tiled
# grid with per-block partials; edge rows masked in-kernel by a select.
# ---------------------------------------------------------------------------
def _bce_sum_kernel(p_ref, t_ref, out_ref, *, n_rows):
    i = pl.program_id(0)
    p = p_ref[...].astype(jnp.float32)                  # (BT, T)
    t = t_ref[...].astype(jnp.float32)
    bt = p.shape[0]
    row_valid = (jax.lax.broadcasted_iota(jnp.int32, p.shape, 0) + i * bt) < n_rows
    log_p = jnp.maximum(jnp.log(p), -100.0)
    log_1mp = jnp.maximum(jnp.log(1.0 - p), -100.0)
    term = -(t * log_p + (1.0 - t) * log_1mp)
    out_ref[...] = jnp.reshape(jnp.sum(jnp.where(row_valid, term, 0.0)), (1, 1, 1))


def bce_mean(prob_w, token, *, vmem_budget_bytes=8 * 1024 * 1024):
    B, T = prob_w.shape
    if B <= 8:
        bt = B                                          # single full-array block
    else:
        # 2 arrays x 2 buffers x T x 4B per row in f32.
        max_rows = max(8, (vmem_budget_bytes // (4 * T * 4)) // 8 * 8)
        bt = max(8, min((B // 8) * 8, max_rows))
    nb = -(-B // bt)

    kernel = functools.partial(_bce_sum_kernel, n_rows=B)
    parts = pl.pallas_call(
        kernel,
        out_shape=jax.ShapeDtypeStruct((nb, 1, 1), jnp.float32),
        grid=(nb,),
        in_specs=[
            pl.BlockSpec((bt, T), lambda i: (i, 0)),
            pl.BlockSpec((bt, T), lambda i: (i, 0)),
        ],
        out_specs=pl.BlockSpec((1, 1, 1), lambda i: (i, 0, 0)),
        compiler_params=pltpu.CompilerParams(
            dimension_semantics=("parallel",)),
    )(prob_w, token)
    return jnp.sum(parts) / (B * T)


# ---------------------------------------------------------------------------
# Module-equivalent wrapper (single jit over all pallas_calls + combination)
# ---------------------------------------------------------------------------
class LanguageModelWeightMulOutWithWeightCriterion:
    def __init__(self, alpha, verbose=False):
        self.alpha = float(alpha)
        # TODO(synk): the PyTorch module prints the partial losses every call;
        # that forces a device->host sync, so it is opt-in here (verbose=True).
        self.verbose = verbose
        self._fn = jax.jit(self._forward)

    def _forward(self, inputs, target, mask, prob_w, token):
        loss = jnp.float32(0.0)
        # TODO(synk): inputs sharing one vocab could be fused into one
        # pallas_call (concat rows + per-row input id), but the wrapper-side
        # concat costs a full extra HBM pass over the logp tensors, which
        # outweighs the per-call ramp for typical sizes; kept per-input calls.
        for inp in inputs:
            s, c = masked_nll_sums(inp, target, mask)
            # NOTE: like the torch original, an all-zero mask gives c == 0 and
            # therefore inf/NaN here (semantics preserved).
            loss = loss + s / c
        loss_bce = bce_mean(prob_w, token)
        out = loss * self.alpha + loss_bce * (1.0 - self.alpha)
        return loss, loss_bce, out

    def __call__(self, inputs, target, mask, prob_w, token):
        loss, loss_bce, out = self._fn(tuple(inputs), target, mask, prob_w, token)
        if self.verbose:
            print('loss:{:.3f} loss_bce:{:.3f}'.format(float(loss),
                                                       float(loss_bce)))
        return out


# ---------------------------------------------------------------------------
# Pure-JAX reference for a sanity check
# ---------------------------------------------------------------------------
def _reference(inputs, target, mask, prob_w, token, alpha):
    total = 0.0
    for inp in inputs:
        B, T, V = inp.shape
        t1 = target[:, :T]
        m1 = mask[:, :T].astype(jnp.float32)
        g = jnp.take_along_axis(inp, t1[..., None], axis=2)[..., 0]
        total = total + jnp.sum(-g * m1) / jnp.sum(m1 > 0)
    p = prob_w.astype(jnp.float32)
    t = token.astype(jnp.float32)
    bce = jnp.mean(-(t * jnp.maximum(jnp.log(p), -100.0)
                     + (1 - t) * jnp.maximum(jnp.log(1 - p), -100.0)))
    return total * alpha + bce * (1 - alpha)


if __name__ == "__main__":
    key = jax.random.PRNGKey(0)
    k1, k2, k3, k4, k5, k6 = jax.random.split(key, 6)

    B, T_max, V = 2, 8, 32
    T_list = [8, 6]
    alpha = 0.7

    # list of log-prob tensors (B, T_i, V)
    inputs = []
    for i, Ti in enumerate(T_list):
        logits = jax.random.normal(jax.random.fold_in(k1, i), (B, Ti, V),
                                   dtype=jnp.float32)
        inputs.append(jax.nn.log_softmax(logits, axis=-1))

    target = jax.random.randint(k2, (B, T_max), 0, V, dtype=jnp.int32)
    # mask: ones with trailing zeros (variable-length captions)
    lengths = jnp.array([7, 5], dtype=jnp.int32)
    mask = (jnp.arange(T_max)[None, :] < lengths[:, None]).astype(jnp.float32)

    prob_w = jax.nn.sigmoid(jax.random.normal(k4, (B, T_max), jnp.float32))
    token = jax.random.bernoulli(k5, 0.5, (B, T_max)).astype(jnp.float32)

    criterion = LanguageModelWeightMulOutWithWeightCriterion(alpha)
    out = criterion(inputs, target, mask, prob_w, token)
    out = jax.block_until_ready(out)

    ref = _reference(inputs, target, mask, prob_w, token, alpha)
    assert jnp.allclose(out, ref, rtol=1e-5, atol=1e-5), (out, ref)

    print("KERNEL_OK")
</pallas_src>

<mosaic_0001>
module attributes {stable_mosaic.version = 11 : i64} {
  func.func @_masked_nll_kernel(%arg0: i32, %arg1: memref<8x32xf32, #tpu.memory_space<vmem>>, %arg2: memref<8x1xi32, #tpu.memory_space<vmem>>, %arg3: memref<8x1xf32, #tpu.memory_space<vmem>>, %arg4: memref<1x1x2xf32, #tpu.memory_space<vmem>>) attributes {dimension_semantics = [#tpu.dimension_semantics<parallel>], iteration_bounds = array<i64: 2>, scalar_prefetch = 0 : i64, scratch_operands = 0 : i64, tpu.core_type = #tpu.core_type<tc>, window_params = [{transform_indices = @transform_0, window_bounds = array<i64: 8, 32>}, {transform_indices = @transform_1, window_bounds = array<i64: 8, 1>}, {transform_indices = @transform_2, window_bounds = array<i64: 8, 1>}, {transform_indices = @transform_3, window_bounds = array<i64: 1, 1, 2>}]} {
    %c0 = arith.constant 0 : index
    %c0_0 = arith.constant 0 : index
    %0 = vector.load %arg1[%c0, %c0_0] : memref<8x32xf32, #tpu.memory_space<vmem>>, vector<8x32xf32>
    %c0_1 = arith.constant 0 : index
    %c0_2 = arith.constant 0 : index
    %1 = vector.load %arg2[%c0_1, %c0_2] : memref<8x1xi32, #tpu.memory_space<vmem>>, vector<8x1xi32>
    %c0_3 = arith.constant 0 : index
    %c0_4 = arith.constant 0 : index
    %2 = vector.load %arg3[%c0_3, %c0_4] : memref<8x1xf32, #tpu.memory_space<vmem>>, vector<8x1xf32>
    %3 = tpu.iota {dimensions = array<i32: 0>} : vector<8x1xi32>
    %c8_i32 = arith.constant 8 : i32
    %4 = arith.muli %arg0, %c8_i32 : i32
    %5 = vector.broadcast %4 : i32 to vector<8x1xi32>
    %6 = arith.addi %3, %5 : vector<8x1xi32>
    %c12_i32 = arith.constant 12 : i32
    %7 = vector.broadcast %c12_i32 : i32 to vector<8x1xi32>
    %8 = arith.cmpi slt, %6, %7 : vector<8x1xi32>
    %cst = arith.constant 0.000000e+00 : f32
    %9 = vector.broadcast %cst : f32 to vector<8x1xf32>
    %10 = arith.select %8, %2, %9 : vector<8x1xi1>, vector<8x1xf32>
    %11 = tpu.iota {dimensions = array<i32: 1>} : vector<8x32xi32>
    %12 = vector.broadcast %1 : vector<8x1xi32> to vector<8x32xi32>
    %13 = arith.cmpi eq, %11, %12 : vector<8x32xi32>
    %cst_5 = arith.constant 0.000000e+00 : f32
    %14 = vector.broadcast %cst_5 : f32 to vector<8x32xf32>
    %15 = arith.select %13, %0, %14 : vector<8x32xi1>, vector<8x32xf32>
    %cst_6 = arith.constant dense<0.000000e+00> : vector<8xf32>
    %16 = vector.multi_reduction <add>, %15, %cst_6 [1] : vector<8x32xf32> to vector<8xf32>
    %17 = vector.shape_cast %16 : vector<8xf32> to vector<8x1xf32>
    %cst_7 = arith.constant 0.000000e+00 : f32
    %18 = vector.broadcast %cst_7 : f32 to vector<8x1xf32>
    %19 = arith.cmpf one, %10, %18 : vector<8x1xf32>
    %cst_8 = arith.constant 0.000000e+00 : f32
    %20 = vector.broadcast %cst_8 : f32 to vector<8x1xf32>
    %21 = arith.select %19, %17, %20 : vector<8x1xi1>, vector<8x1xf32>
    %22 = arith.mulf %21, %10 : vector<8x1xf32>
    %23 = vector.shape_cast %22 : vector<8x1xf32> to vector<1x8x1xf32>
    %cst_9 = arith.constant dense<0.000000e+00> : vector<1xf32>
    %24 = vector.multi_reduction <add>, %23, %cst_9 [1, 2] : vector<1x8x1xf32> to vector<1xf32>
    %25 = vector.shape_cast %24 : vector<1xf32> to vector<1x1x1xf32>
    %26 = vector.extract %25[0, 0, 0] : f32 from vector<1x1x1xf32>
    %cst_10 = arith.constant 0.000000e+00 : f32
    %27 = arith.subf %cst_10, %26 : f32
    %cst_11 = arith.constant 0.000000e+00 : f32
    %28 = vector.broadcast %cst_11 : f32 to vector<8x1xf32>
    %29 = arith.cmpf ogt, %10, %28 : vector<8x1xf32>
    %30 = arith.extui %29 : vector<8x1xi1> to vector<8x1xi32>
    %31 = arith.sitofp %30 : vector<8x1xi32> to vector<8x1xf32>
    %32 = vector.shape_cast %31 : vector<8x1xf32> to vector<1x8x1xf32>
    %cst_12 = arith.constant dense<0.000000e+00> : vector<1xf32>
    %33 = vector.multi_reduction <add>, %32, %cst_12 [1, 2] : vector<1x8x1xf32> to vector<1xf32>
    %34 = vector.shape_cast %33 : vector<1xf32> to vector<1x1x1xf32>
    %35 = vector.extract %34[0, 0, 0] : f32 from vector<1x1x1xf32>
    %36 = tpu.iota {dimensions = array<i32: 2>} : vector<1x1x2xi32>
    %c0_i32 = arith.constant 0 : i32
    %37 = vector.broadcast %c0_i32 : i32 to vector<1x1x2xi32>
    %38 = arith.cmpi eq, %36, %37 : vector<1x1x2xi32>
    %39 = vector.broadcast %27 : f32 to vector<1x1x2xf32>
    %40 = vector.broadcast %35 : f32 to vector<1x1x2xf32>
    %41 = arith.select %38, %39, %40 : vector<1x1x2xi1>, vector<1x1x2xf32>
    %c0_13 = arith.constant 0 : index
    %c0_14 = arith.constant 0 : index
    %c0_15 = arith.constant 0 : index
    %42 = vector.load %arg4[%c0_13, %c0_14, %c0_15] : memref<1x1x2xf32, #tpu.memory_space<vmem>>, vector<1x1x2xf32>
    tpu.vector_store %arg4[%c0_13, %c0_14, %c0_15], %41 {strides = array<i32>} : memref<1x1x2xf32, #tpu.memory_space<vmem>>, vector<1x1x2xf32>,
    return
  }
  func.func @transform_0(%arg0: i32) -> (i32, i32) {
    %c0_i32 = arith.constant 0 : i32
    %c0_i32_0 = arith.constant 0 : i32
    return %arg0, %c0_i32 : i32, i32
  }
  func.func @transform_1(%arg0: i32) -> (i32, i32) {
    %c0_i32 = arith.constant 0 : i32
    %c0_i32_0 = arith.constant 0 : i32
    return %arg0, %c0_i32 : i32, i32
  }
  func.func @transform_2(%arg0: i32) -> (i32, i32) {
    %c0_i32 = arith.constant 0 : i32
    %c0_i32_0 = arith.constant 0 : i32
    return %arg0, %c0_i32 : i32, i32
  }
  func.func @transform_3(%arg0: i32) -> (i32, i32, i32) {
    %c0_i32 = arith.constant 0 : i32
    %c0_i32_0 = arith.constant 0 : i32
    %c0_i32_1 = arith.constant 0 : i32
    return %arg0, %c0_i32, %c0_i32_0 : i32, i32, i32
  }
}

module attributes {stable_mosaic.version = 11 : i64} {
  func.func @_bce_sum_kernel(%arg0: i32, %arg1: memref<2x8xf32, #tpu.memory_space<vmem>>, %arg2: memref<2x8xf32, #tpu.memory_space<vmem>>, %arg3: memref<1x1x1xf32, #tpu.memory_space<vmem>>) attributes {dimension_semantics = [#tpu.dimension_semantics<parallel>], iteration_bounds = array<i64: 1>, scalar_prefetch = 0 : i64, scratch_operands = 0 : i64, tpu.core_type = #tpu.core_type<tc>, window_params = [{transform_indices = @transform_0, window_bounds = array<i64: 2, 8>}, {transform_indices = @transform_1, window_bounds = array<i64: 2, 8>}, {transform_indices = @transform_2, window_bounds = array<i64: 1, 1, 1>}]} {
    %c0 = arith.constant 0 : index
    %c0_0 = arith.constant 0 : index
    %0 = vector.load %arg1[%c0, %c0_0] : memref<2x8xf32, #tpu.memory_space<vmem>>, vector<2x8xf32>
    %c0_1 = arith.constant 0 : index
    %c0_2 = arith.constant 0 : index
    %1 = vector.load %arg2[%c0_1, %c0_2] : memref<2x8xf32, #tpu.memory_space<vmem>>, vector<2x8xf32>
    %2 = tpu.iota {dimensions = array<i32: 0>} : vector<2x8xi32>
    %c2_i32 = arith.constant 2 : i32
    %3 = arith.muli %arg0, %c2_i32 : i32
    %4 = vector.broadcast %3 : i32 to vector<2x8xi32>
    %5 = arith.addi %2, %4 : vector<2x8xi32>
    %c2_i32_3 = arith.constant 2 : i32
    %6 = vector.broadcast %c2_i32_3 : i32 to vector<2x8xi32>
    %7 = arith.cmpi slt, %5, %6 : vector<2x8xi32>
    %8 = math.log %0 : vector<2x8xf32>
    %cst = arith.constant -1.000000e+02 : f32
    %9 = vector.broadcast %cst : f32 to vector<2x8xf32>
    %10 = arith.maximumf %8, %9 : vector<2x8xf32>
    %cst_4 = arith.constant 1.000000e+00 : f32
    %11 = vector.broadcast %cst_4 : f32 to vector<2x8xf32>
    %12 = arith.subf %11, %0 : vector<2x8xf32>
    %13 = math.log %12 : vector<2x8xf32>
    %cst_5 = arith.constant -1.000000e+02 : f32
    %14 = vector.broadcast %cst_5 : f32 to vector<2x8xf32>
    %15 = arith.maximumf %13, %14 : vector<2x8xf32>
    %16 = arith.mulf %1, %10 : vector<2x8xf32>
    %cst_6 = arith.constant 1.000000e+00 : f32
    %17 = vector.broadcast %cst_6 : f32 to vector<2x8xf32>
    %18 = arith.subf %17, %1 : vector<2x8xf32>
    %19 = arith.mulf %18, %15 : vector<2x8xf32>
    %20 = arith.addf %16, %19 : vector<2x8xf32>
    %cst_7 = arith.constant 0.000000e+00 : f32
    %21 = vector.broadcast %cst_7 : f32 to vector<2x8xf32>
    %22 = arith.subf %21, %20 : vector<2x8xf32>
    %cst_8 = arith.constant 0.000000e+00 : f32
    %23 = vector.broadcast %cst_8 : f32 to vector<2x8xf32>
    %24 = arith.select %7, %22, %23 : vector<2x8xi1>, vector<2x8xf32>
    %25 = vector.shape_cast %24 : vector<2x8xf32> to vector<1x2x8xf32>
    %cst_9 = arith.constant dense<0.000000e+00> : vector<1xf32>
    %26 = vector.multi_reduction <add>, %25, %cst_9 [1, 2] : vector<1x2x8xf32> to vector<1xf32>
    %27 = vector.shape_cast %26 : vector<1xf32> to vector<1x1x1xf32>
    %28 = vector.extract %27[0, 0, 0] : f32 from vector<1x1x1xf32>
    %29 = vector.broadcast %28 : f32 to vector<1x1x1xf32>
    %c0_10 = arith.constant 0 : index
    %c0_11 = arith.constant 0 : index
    %c0_12 = arith.constant 0 : index
    %30 = vector.load %arg3[%c0_10, %c0_11, %c0_12] : memref<1x1x1xf32, #tpu.memory_space<vmem>>, vector<1x1x1xf32>
    tpu.vector_store %arg3[%c0_10, %c0_11, %c0_12], %29 {strides = array<i32>} : memref<1x1x1xf32, #tpu.memory_space<vmem>>, vector<1x1x1xf32>,
    return
  }
  func.func @transform_0(%arg0: i32) -> (i32, i32) {
    %c0_i32 = arith.constant 0 : i32
    %c0_i32_0 = arith.constant 0 : i32
    return %arg0, %c0_i32 : i32, i32
  }
  func.func @transform_1(%arg0: i32) -> (i32, i32) {
    %c0_i32 = arith.constant 0 : i32
    %c0_i32_0 = arith.constant 0 : i32
    return %arg0, %c0_i32 : i32, i32
  }
  func.func @transform_2(%arg0: i32) -> (i32, i32, i32) {
    %c0_i32 = arith.constant 0 : i32
    %c0_i32_0 = arith.constant 0 : i32
    %c0_i32_1 = arith.constant 0 : i32
    return %arg0, %c0_i32, %c0_i32_0 : i32, i32, i32
  }
}

module attributes {stable_mosaic.version = 11 : i64} {
  func.func @_masked_nll_kernel(%arg0: i32, %arg1: memref<8x32xf32, #tpu.memory_space<vmem>>, %arg2: memref<8x1xi32, #tpu.memory_space<vmem>>, %arg3: memref<8x1xf32, #tpu.memory_space<vmem>>, %arg4: memref<1x1x2xf32, #tpu.memory_space<vmem>>) attributes {dimension_semantics = [#tpu.dimension_semantics<parallel>], iteration_bounds = array<i64: 2>, scalar_prefetch = 0 : i64, scratch_operands = 0 : i64, tpu.core_type = #tpu.core_type<tc>, window_params = [{transform_indices = @transform_0, window_bounds = array<i64: 8, 32>}, {transform_indices = @transform_1, window_bounds = array<i64: 8, 1>}, {transform_indices = @transform_2, window_bounds = array<i64: 8, 1>}, {transform_indices = @transform_3, window_bounds = array<i64: 1, 1, 2>}]} {
    %c0 = arith.constant 0 : index
    %c0_0 = arith.constant 0 : index
    %0 = vector.load %arg1[%c0, %c0_0] : memref<8x32xf32, #tpu.memory_space<vmem>>, vector<8x32xf32>
    %c0_1 = arith.constant 0 : index
    %c0_2 = arith.constant 0 : index
    %1 = vector.load %arg2[%c0_1, %c0_2] : memref<8x1xi32, #tpu.memory_space<vmem>>, vector<8x1xi32>
    %c0_3 = arith.constant 0 : index
    %c0_4 = arith.constant 0 : index
    %2 = vector.load %arg3[%c0_3, %c0_4] : memref<8x1xf32, #tpu.memory_space<vmem>>, vector<8x1xf32>
    %3 = tpu.iota {dimensions = array<i32: 0>} : vector<8x1xi32>
    %c8_i32 = arith.constant 8 : i32
    %4 = arith.muli %arg0, %c8_i32 : i32
    %5 = vector.broadcast %4 : i32 to vector<8x1xi32>
    %6 = arith.addi %3, %5 : vector<8x1xi32>
    %c16_i32 = arith.constant 16 : i32
    %7 = vector.broadcast %c16_i32 : i32 to vector<8x1xi32>
    %8 = arith.cmpi slt, %6, %7 : vector<8x1xi32>
    %cst = arith.constant 0.000000e+00 : f32
    %9 = vector.broadcast %cst : f32 to vector<8x1xf32>
    %10 = arith.select %8, %2, %9 : vector<8x1xi1>, vector<8x1xf32>
    %11 = tpu.iota {dimensions = array<i32: 1>} : vector<8x32xi32>
    %12 = vector.broadcast %1 : vector<8x1xi32> to vector<8x32xi32>
    %13 = arith.cmpi eq, %11, %12 : vector<8x32xi32>
    %cst_5 = arith.constant 0.000000e+00 : f32
    %14 = vector.broadcast %cst_5 : f32 to vector<8x32xf32>
    %15 = arith.select %13, %0, %14 : vector<8x32xi1>, vector<8x32xf32>
    %cst_6 = arith.constant dense<0.000000e+00> : vector<8xf32>
    %16 = vector.multi_reduction <add>, %15, %cst_6 [1] : vector<8x32xf32> to vector<8xf32>
    %17 = vector.shape_cast %16 : vector<8xf32> to vector<8x1xf32>
    %cst_7 = arith.constant 0.000000e+00 : f32
    %18 = vector.broadcast %cst_7 : f32 to vector<8x1xf32>
    %19 = arith.cmpf one, %10, %18 : vector<8x1xf32>
    %cst_8 = arith.constant 0.000000e+00 : f32
    %20 = vector.broadcast %cst_8 : f32 to vector<8x1xf32>
    %21 = arith.select %19, %17, %20 : vector<8x1xi1>, vector<8x1xf32>
    %22 = arith.mulf %21, %10 : vector<8x1xf32>
    %23 = vector.shape_cast %22 : vector<8x1xf32> to vector<1x8x1xf32>
    %cst_9 = arith.constant dense<0.000000e+00> : vector<1xf32>
    %24 = vector.multi_reduction <add>, %23, %cst_9 [1, 2] : vector<1x8x1xf32> to vector<1xf32>
    %25 = vector.shape_cast %24 : vector<1xf32> to vector<1x1x1xf32>
    %26 = vector.extract %25[0, 0, 0] : f32 from vector<1x1x1xf32>
    %cst_10 = arith.constant 0.000000e+00 : f32
    %27 = arith.subf %cst_10, %26 : f32
    %cst_11 = arith.constant 0.000000e+00 : f32
    %28 = vector.broadcast %cst_11 : f32 to vector<8x1xf32>
    %29 = arith.cmpf ogt, %10, %28 : vector<8x1xf32>
    %30 = arith.extui %29 : vector<8x1xi1> to vector<8x1xi32>
    %31 = arith.sitofp %30 : vector<8x1xi32> to vector<8x1xf32>
    %32 = vector.shape_cast %31 : vector<8x1xf32> to vector<1x8x1xf32>
    %cst_12 = arith.constant dense<0.000000e+00> : vector<1xf32>
    %33 = vector.multi_reduction <add>, %32, %cst_12 [1, 2] : vector<1x8x1xf32> to vector<1xf32>
    %34 = vector.shape_cast %33 : vector<1xf32> to vector<1x1x1xf32>
    %35 = vector.extract %34[0, 0, 0] : f32 from vector<1x1x1xf32>
    %36 = tpu.iota {dimensions = array<i32: 2>} : vector<1x1x2xi32>
    %c0_i32 = arith.constant 0 : i32
    %37 = vector.broadcast %c0_i32 : i32 to vector<1x1x2xi32>
    %38 = arith.cmpi eq, %36, %37 : vector<1x1x2xi32>
    %39 = vector.broadcast %27 : f32 to vector<1x1x2xf32>
    %40 = vector.broadcast %35 : f32 to vector<1x1x2xf32>
    %41 = arith.select %38, %39, %40 : vector<1x1x2xi1>, vector<1x1x2xf32>
    %c0_13 = arith.constant 0 : index
    %c0_14 = arith.constant 0 : index
    %c0_15 = arith.constant 0 : index
    %42 = vector.load %arg4[%c0_13, %c0_14, %c0_15] : memref<1x1x2xf32, #tpu.memory_space<vmem>>, vector<1x1x2xf32>
    tpu.vector_store %arg4[%c0_13, %c0_14, %c0_15], %41 {strides = array<i32>} : memref<1x1x2xf32, #tpu.memory_space<vmem>>, vector<1x1x2xf32>,
    return
  }
  func.func @transform_0(%arg0: i32) -> (i32, i32) {
    %c0_i32 = arith.constant 0 : i32
    %c0_i32_0 = arith.constant 0 : i32
    return %arg0, %c0_i32 : i32, i32
  }
  func.func @transform_1(%arg0: i32) -> (i32, i32) {
    %c0_i32 = arith.constant 0 : i32
    %c0_i32_0 = arith.constant 0 : i32
    return %arg0, %c0_i32 : i32, i32
  }
  func.func @transform_2(%arg0: i32) -> (i32, i32) {
    %c0_i32 = arith.constant 0 : i32
    %c0_i32_0 = arith.constant 0 : i32
    return %arg0, %c0_i32 : i32, i32
  }
  func.func @transform_3(%arg0: i32) -> (i32, i32, i32) {
    %c0_i32 = arith.constant 0 : i32
    %c0_i32_0 = arith.constant 0 : i32
    %c0_i32_1 = arith.constant 0 : i32
    return %arg0, %c0_i32, %c0_i32_0 : i32, i32, i32
  }
}

</mosaic_0001>

<bundles_post_ra>
// kernel: _forward.4
= control target key start
LH: loop header
LB: loop body
LE: loop exit
PB: predicated region body
PF: predicated region fallthrough
CT: control target
= control target key end

     0   :  { %s381_s12 = smov 0   ;;  %s408_s0 = inlined_call_operand.vmem [shape: f32[12,32], index: 0, kind: input, shape index: {}]   ;;  %s409_s1 = inlined_call_operand.vmem [shape: s32[12,1], index: 1, kind: input, shape index: {}]   ;;  %s410_s2 = inlined_call_operand.vmem [shape: f32[12,1], index: 2, kind: input, shape index: {}]   ;;  %s411_s3 = inlined_call_operand.vmem [shape: f32[2,1,2], index: 3, kind: output, shape index: {}]  }
   0x1 LB: > { %s324_s13 = sadd.s32 4294967295, %s357_s12   ;;  %p328_p0 = scmp.ge.s32.totalorder %s357_s12, 1  ;;  %s357_s12 = sphi %s381_s12, %s13_s12  }
   0x2   : > { %p154_p1 = scmp.lt.s32.totalorder %s357_s12, 3 }
   0x4   : > { %p155_p2 = pnand %p328_p0, %p154_p1 }
   0x5   : > { %p183_p3 = scmp.lt.s32.totalorder (!%p155_p2), %s324_s13, 1  ;;  %v359_v0 = vmov (!%p155_p2), 0   ;;  %v201_v2 = vlaneseq (!%p155_p2)  ;;  %s332_s22 = sshll.u32 (!%p155_p2), %s324_s13, 3  ;;  %vm215_vm1 = vcmask (!%p155_p2), 261120   ;;  %vm222_vm5 = vcmask (!%p155_p2), 7168  }
   0x6   : > { %158 = sbr.rel (%p155_p2) target bundleno = 506 (0x1fa), region = 32  ;;  %350 = vset.pattern.permute.xlu0 (!%p155_p2), %v359_v0  ;;  %v204_v4 = vstv (!%p155_p2), %s332_s22  ;;  %v360_v16 = vmov (!%p155_p2), 0.0   ;;  %vm251_vm7 = vcmask (!%p155_p2), 8192  }
   0x7   : > { %v202_v3 = vshrl.u32 (!%p155_p2), %v201_v2, 7  ;;  %v209_v8 = vand.u32 (!%p155_p2), 127, %v201_v2 }
   0x9   : > { %v205_v6 = vadd.s32 (!%p155_p2), %v204_v4, %v202_v3  ;;  %vm247_vm6 = vcmp.eq.s32.totalorder (!%p155_p2), %v209_v8, 0 }
   0xb   : > { %vm206_vm0 = vcmp.lt.s32.totalorder (!%p155_p2), %v205_v6, 12 }
   0xd   : > { %s389_s14 = scalar_select %p183_p3, %s324_s13, 1 }
   0xf   : > { %s329_s15 = sshll.u32 %s389_s14, 3  ;;  %s197_s30 = scalar_lea.vmem %s411_s3, %s389_s14 }
  0x10   : > { %s190_s18 = scalar_lea.vmem %s409_s1, %s329_s15  ;;  %s194_s21 = scalar_lea.vmem %s410_s2, %s329_s15 }
  0x11   : > { %v199_v1 = vld [vmem:[%s190_s18] sm:$0xff]  ;;  %s186_s25 = scalar_lea.vmem %s408_s0, %s329_s15 }
  0x12   : > { %211 = vperm.xlu0 %350, %v199_v1   ;;  %v200_v5 = vld [vmem:[%s194_s21] sm:$0xff] }
  0x13   : > { %v207_v7 = vsel %vm206_vm0, %v200_v5, 0.0  ;;  %v198_v9 = vld [vmem:[%s186_s25] sm:$0xff] }
  0x14   : > { %vm219_vm3 = vcmp.ne.f32.partialorder %v207_v7, 0.0  ;;  %vm234_vm4 = vcmp.gt.f32.partialorder %v207_v7, 0.0 }
  0x15   : > { %v333_v17 = vsel %vm234_vm4, 1.0, %v360_v16 }
  0x16   : > { %v237_v19 = vsel %vm222_vm5, %v333_v17, 0.0 }
  0x91   : > { %v212_v10 = vpop.permute.xlu0 %211 }
  0x92   : > { %vm213_vm2 = vcmp.eq.s32.totalorder %v209_v8, %v212_v10 }
  0x93   : > { %v214_v11 = vsel %vm213_vm2, %v198_v9, 0.0 }
  0x94   : > { %v216_v12 = vsel %vm215_vm1, %v214_v11, 0.0 }
  0x95   : > { %217 = vadd.xlane.f32.xlu0 %v216_v12 }
 0x122   : > { %v218_v13 = vpop.xlane.xlu0 %217 }
 0x123   : > { %v220_v14 = vsel %vm219_vm3, %v218_v13, 0.0 }
 0x124   : > { %v221_v15 = vmul.f32 %v220_v14, %v207_v7 }
 0x126   : > { %v223_v18 = vsel %vm222_vm5, %v221_v15, 0.0 }
 0x127   : > { %224 = vadd.xlane.f32.xlu1 %v223_v18 }
 0x12b   : > { %238 = vadd.xlane.f32.xlu1 %v237_v19 }
 0x1b4   : > { %v225_v20 = vpop.xlane.xlu1 %224 }
 0x1b5   : > { %v226_v21 = vrot.slane %v225_v20, 4 }
 0x1b7   : > { %v227_v22 = vadd.f32 %v226_v21, %v225_v20 }
 0x1b8   : > { %v239_v23 = vpop.xlane.xlu1 %238 }
 0x1b9   : > { %v228_v24 = vrot.slane %v227_v22, 2  ;;  %v240_v25 = vrot.slane %v239_v23, 4 }
 0x1bb   : > { %v241_v26 = vadd.f32 %v240_v25, %v239_v23  ;;  %v229_v27 = vadd.f32 %v228_v24, %v227_v22 }
 0x1bd   : > { %v242_v28 = vrot.slane %v241_v26, 2  ;;  %v230_v29 = vrot.slane %v229_v27, 1 }
 0x1bf   : > { %v243_v30 = vadd.f32 %v242_v28, %v241_v26  ;;  %v231_v31 = vadd.f32 %v230_v29, %v229_v27 }
 0x1c1   : > { %336 = vpush %v231_v31  ;;  %v244_v32 = vrot.slane %v243_v30, 1 }
 0x1c3   : > { %v245_v33 = vadd.f32 %v244_v32, %v243_v30 }
 0x1c5   : > { %338 = vpush %v245_v33 }
 0x1f2   : > { %s337_s26 = spop %336 }
 0x1f3   : > { %s233_s27 = ssub.f32 0.0, %s337_s26 }
 0x1f5   : > { %v248_v34 = vstv %s233_s27 }
 0x1f6   : > { %s339_s4 = spop %338 }
 0x1f7   : > { %v249_v35 = vstv %s339_s4 }
 0x1f8   : > { %v250_v36 = vsel %vm247_vm6, %v248_v34, %v249_v35 }
 0x1f9   : > { %252 = vst.msk [vmem:[%s197_s30] sm:$0x1] %vm251_vm7, %v250_v36 }
 0x1fa PF: > { %s13_s12 = sadd.s32 1, %s357_s12  }
 0x1fb   : > { %p10_p4 = scmp.ge.s32.totalorder %s13_s12, 4  }
 0x1fd   :  { %12 = sbr.rel (!%p10_p4) target bundleno = 1 (0x1), region = 68 }

// kernel: _forward.3
= control target key start
LH: loop header
LB: loop body
LE: loop exit
PB: predicated region body
PF: predicated region fallthrough
CT: control target
= control target key end

     0   :  { %s381_s12 = smov 0   ;;  %s408_s0 = inlined_call_operand.vmem [shape: f32[16,32], index: 0, kind: input, shape index: {}]   ;;  %s409_s1 = inlined_call_operand.vmem [shape: s32[16,1], index: 1, kind: input, shape index: {}]   ;;  %s410_s2 = inlined_call_operand.vmem [shape: f32[16,1], index: 2, kind: input, shape index: {}]   ;;  %s411_s3 = inlined_call_operand.vmem [shape: f32[2,1,2], index: 3, kind: output, shape index: {}]  }
   0x1 LB: > { %s324_s13 = sadd.s32 4294967295, %s357_s12   ;;  %p328_p0 = scmp.ge.s32.totalorder %s357_s12, 1  ;;  %s357_s12 = sphi %s381_s12, %s13_s12  }
   0x2   : > { %p154_p1 = scmp.lt.s32.totalorder %s357_s12, 3 }
   0x4   : > { %p155_p2 = pnand %p328_p0, %p154_p1 }
   0x5   : > { %p183_p3 = scmp.lt.s32.totalorder (!%p155_p2), %s324_s13, 1  ;;  %v359_v0 = vmov (!%p155_p2), 0   ;;  %v201_v2 = vlaneseq (!%p155_p2)  ;;  %s332_s22 = sshll.u32 (!%p155_p2), %s324_s13, 3  ;;  %vm215_vm1 = vcmask (!%p155_p2), 261120   ;;  %vm222_vm5 = vcmask (!%p155_p2), 7168  }
   0x6   : > { %158 = sbr.rel (%p155_p2) target bundleno = 506 (0x1fa), region = 32  ;;  %350 = vset.pattern.permute.xlu0 (!%p155_p2), %v359_v0  ;;  %v204_v4 = vstv (!%p155_p2), %s332_s22  ;;  %v360_v16 = vmov (!%p155_p2), 0.0   ;;  %vm251_vm7 = vcmask (!%p155_p2), 8192  }
   0x7   : > { %v202_v3 = vshrl.u32 (!%p155_p2), %v201_v2, 7  ;;  %v209_v8 = vand.u32 (!%p155_p2), 127, %v201_v2 }
   0x9   : > { %v205_v6 = vadd.s32 (!%p155_p2), %v204_v4, %v202_v3  ;;  %vm247_vm6 = vcmp.eq.s32.totalorder (!%p155_p2), %v209_v8, 0 }
   0xb   : > { %vm206_vm0 = vcmp.lt.s32.totalorder (!%p155_p2), %v205_v6, 16 }
   0xd   : > { %s389_s14 = scalar_select %p183_p3, %s324_s13, 1 }
   0xf   : > { %s329_s15 = sshll.u32 %s389_s14, 3  ;;  %s197_s30 = scalar_lea.vmem %s411_s3, %s389_s14 }
  0x10   : > { %s190_s18 = scalar_lea.vmem %s409_s1, %s329_s15  ;;  %s194_s21 = scalar_lea.vmem %s410_s2, %s329_s15 }
  0x11   : > { %v199_v1 = vld [vmem:[%s190_s18] sm:$0xff]  ;;  %s186_s25 = scalar_lea.vmem %s408_s0, %s329_s15 }
  0x12   : > { %211 = vperm.xlu0 %350, %v199_v1   ;;  %v200_v5 = vld [vmem:[%s194_s21] sm:$0xff] }
  0x13   : > { %v207_v7 = vsel %vm206_vm0, %v200_v5, 0.0  ;;  %v198_v9 = vld [vmem:[%s186_s25] sm:$0xff] }
  0x14   : > { %vm219_vm3 = vcmp.ne.f32.partialorder %v207_v7, 0.0  ;;  %vm234_vm4 = vcmp.gt.f32.partialorder %v207_v7, 0.0 }
  0x15   : > { %v333_v17 = vsel %vm234_vm4, 1.0, %v360_v16 }
  0x16   : > { %v237_v19 = vsel %vm222_vm5, %v333_v17, 0.0 }
  0x91   : > { %v212_v10 = vpop.permute.xlu0 %211 }
  0x92   : > { %vm213_vm2 = vcmp.eq.s32.totalorder %v209_v8, %v212_v10 }
  0x93   : > { %v214_v11 = vsel %vm213_vm2, %v198_v9, 0.0 }
  0x94   : > { %v216_v12 = vsel %vm215_vm1, %v214_v11, 0.0 }
  0x95   : > { %217 = vadd.xlane.f32.xlu0 %v216_v12 }
 0x122   : > { %v218_v13 = vpop.xlane.xlu0 %217 }
 0x123   : > { %v220_v14 = vsel %vm219_vm3, %v218_v13, 0.0 }
 0x124   : > { %v221_v15 = vmul.f32 %v220_v14, %v207_v7 }
 0x126   : > { %v223_v18 = vsel %vm222_vm5, %v221_v15, 0.0 }
 0x127   : > { %224 = vadd.xlane.f32.xlu1 %v223_v18 }
 0x12b   : > { %238 = vadd.xlane.f32.xlu1 %v237_v19 }
 0x1b4   : > { %v225_v20 = vpop.xlane.xlu1 %224 }
 0x1b5   : > { %v226_v21 = vrot.slane %v225_v20, 4 }
 0x1b7   : > { %v227_v22 = vadd.f32 %v226_v21, %v225_v20 }
 0x1b8   : > { %v239_v23 = vpop.xlane.xlu1 %238 }
 0x1b9   : > { %v228_v24 = vrot.slane %v227_v22, 2  ;;  %v240_v25 = vrot.slane %v239_v23, 4 }
 0x1bb   : > { %v241_v26 = vadd.f32 %v240_v25, %v239_v23  ;;  %v229_v27 = vadd.f32 %v228_v24, %v227_v22 }
 0x1bd   : > { %v242_v28 = vrot.slane %v241_v26, 2  ;;  %v230_v29 = vrot.slane %v229_v27, 1 }
 0x1bf   : > { %v243_v30 = vadd.f32 %v242_v28, %v241_v26  ;;  %v231_v31 = vadd.f32 %v230_v29, %v229_v27 }
 0x1c1   : > { %336 = vpush %v231_v31  ;;  %v244_v32 = vrot.slane %v243_v30, 1 }
 0x1c3   : > { %v245_v33 = vadd.f32 %v244_v32, %v243_v30 }
 0x1c5   : > { %338 = vpush %v245_v33 }
 0x1f2   : > { %s337_s26 = spop %336 }
 0x1f3   : > { %s233_s27 = ssub.f32 0.0, %s337_s26 }
 0x1f5   : > { %v248_v34 = vstv %s233_s27 }
 0x1f6   : > { %s339_s4 = spop %338 }
 0x1f7   : > { %v249_v35 = vstv %s339_s4 }
 0x1f8   : > { %v250_v36 = vsel %vm247_vm6, %v248_v34, %v249_v35 }
 0x1f9   : > { %252 = vst.msk [vmem:[%s197_s30] sm:$0x1] %vm251_vm7, %v250_v36 }
 0x1fa PF: > { %s13_s12 = sadd.s32 1, %s357_s12  }
 0x1fb   : > { %p10_p4 = scmp.ge.s32.totalorder %s13_s12, 4  }
 0x1fd   :  { %12 = sbr.rel (!%p10_p4) target bundleno = 1 (0x1), region = 68 }

// kernel: _forward.5
= control target key start
LH: loop header
LB: loop body
LE: loop exit
PB: predicated region body
PF: predicated region fallthrough
CT: control target
= control target key end

     0   :  { %s126_s0 = inlined_call_operand.vmem [shape: f32[2,8], index: 0, kind: input, shape index: {}]   ;;  %s127_s1 = inlined_call_operand.vmem [shape: f32[2,8], index: 1, kind: input, shape index: {}]   ;;  %s128_s2 = inlined_call_operand.hbm [shape: f32[1,1,1], index: 2, kind: output, shape index: {}]  }
   0x1   :  { %v12_v0 = vld [vmem:[%s126_s0] sm:$0x3] }
   0x2   :  { %64 = vlog2.f32 %v12_v0  ;;  %v23_v1 = vsub.f32 1.0, %v12_v0 }
   0x3   :  { %7 = vsyncpa [#allocation3], 0  ;;  %v13_v3 = vld [vmem:[%s127_s1] sm:$0x3]  ;;  %v14_v6 = vlaneseq  ;;  %vm33_vm1 = vcmask 58368   ;;  %s92_s0 = smov [#allocation2]  }
   0x4   :  { %66 = vlog2.f32 %v23_v1  ;;  %v28_v9 = vsub.f32 1.0, %v13_v3  ;;  %s53_s1 = sshll.u32 %s92_s0, 4  ;;  %vm45_vm2 = vcmask 0   ;;  %s54_s1 = int_to_ptr.vmem [resolvable:$true] %s53_s1 }
   0x5   :  { %v15_v12 = vshrl.u32 %v14_v6, 7  ;;  %s68_s14 = scalar_lea.vmem %s54_s1, 16  ;;  %s72_s15 = scalar_lea.vmem %s54_s1, 32 }
   0x6   :  { %p69_p0 = scmp.ne.s32.totalorder %s54_s1, %s68_s14  ;;  %p73_p1 = scmp.lt.s32.totalorder %s54_s1, %s54_s1 }
   0x7   :  { %vm19_vm0 = vcmp.lt.s32.totalorder %v15_v12, 2  ;;  %p74_p2 = scmp.lt.s32.totalorder %s72_s15, %s68_s14 }
   0x9   :  { %p75_p3 = por %p74_p2, %p73_p1 }
   0xb   :  { %p76_p4 = pnand %p75_p3, %p69_p0 }
   0xc   :  { %v65_v2 = vpop.eup %64 }
   0xd   :  { %v21_v4 = vmul.f32 0.6931472, %v65_v2 }
   0xe   :  { %v67_v5 = vpop.eup %66 }
   0xf   :  { %v22_v7 = vmax.f32 %v21_v4, -100.0  ;;  %v25_v8 = vmul.f32 0.6931472, %v67_v5 }
  0x11   :  { %v26_v10 = vmax.f32 %v25_v8, -100.0  ;;  %v27_v11 = vmul.f32 %v22_v7, %v13_v3 }
  0x13   :  { %v29_v13 = vmul.f32 %v28_v9, %v26_v10 }
  0x15   :  { %v30_v14 = vadd.f32 %v29_v13, %v27_v11 }
  0x17   :  { %v31_v15 = vsub.f32 0.0, %v30_v14 }
  0x19   :  { %v32_v16 = vsel %vm19_vm0, %v31_v15, 0.0 }
  0x1a   :  { %v34_v17 = vsel %vm33_vm1, %v32_v16, 0.0 }
  0x1b   :  { %35 = vadd.xlane.f32.xlu0 %v34_v17 }
  0xa8   :  { %v36_v18 = vpop.xlane.xlu0 %35 }
  0xa9   :  { %v37_v19 = vrot.slane %v36_v18, 4 }
  0xab   :  { %v38_v20 = vadd.f32 %v37_v19, %v36_v18 }
  0xad   :  { %v39_v21 = vrot.slane %v38_v20, 2 }
  0xaf   :  { %v40_v22 = vadd.f32 %v39_v21, %v38_v20 }
  0xb1   :  { %v41_v23 = vrot.slane %v40_v22, 1 }
  0xb3   :  { %v42_v24 = vadd.f32 %v41_v23, %v40_v22 }
  0xb5   :  { %61 = vpush %v42_v24 }
  0xe6   :  { %s62_s13 = spop %61 }
  0xe7   :  { %v44_v25 = vstv %s62_s13 }
  0xe8   :  { %46 = vst.msk [vmem:[#allocation2] sm:$0x1] %vm45_vm2, %v44_v25 }
  0xe9   :  { %79 = shalt.err (!%p76_p4)
}
  0xea   :  { %s80_s18 = scalar_lea.hbm %s128_s2, 16 }
  0xeb   :  { %p81_p5 = scmp.ne.s32.totalorder %s128_s2, %s80_s18  ;;  %p84_p6 = scmp.lt.u32.totalorder %s80_s18, %s128_s2 }
  0xed   :  { %p86_p7 = pnand %p84_p6, %p81_p5 }
  0xef   :  { %89 = shalt.err (!%p86_p7)
}
  0xf0   :  { %56 = dma.vmem_to_hbm [thread:$0]  %s54_s1, 16, %s128_s2, [#allocation3]  }
  0xf1   :  { %90 = dma.done.wait [#allocation3], 16  }
  0xf2   :  { %91 = vsyncadd [#allocation3], 4294967280 }
  0xf3   :  { %60 = vsyncpa [#allocation3], 1 }

</bundles_post_ra>
